<compile_context>
chip_gen: v7x
topology: tpu7x:2x2x1
jax: 0.10.0
libtpu: 0.0.40
codegen_flags: <defaults>
</compile_context>

<pallas_src>
import functools

import jax
import jax.numpy as jnp
from jax.experimental import pallas as pl
from jax.experimental.pallas import tpu as pltpu


def _round_up(x, m):
    return (x + m - 1) // m * m


def _elu_f32(v):
    # ELU(alpha=1), computed in f32. exp of the clamped value avoids inf in
    # the unselected branch of jnp.where.
    return jnp.where(v > 0.0, v, jnp.exp(jnp.minimum(v, 0.0)) - 1.0)


def critic_kernel(x_ref,
                  w1_ref, b1_ref,
                  w2_ref, b2_ref,
                  w3_ref, b3_ref,
                  w4_ref, b4_ref,
                  out_ref):
    # Hidden layers: bf16 MXU operands, f32 accumulation, f32 bias/ELU.
    h = jnp.dot(x_ref[...].astype(jnp.bfloat16), w1_ref[...],
                preferred_element_type=jnp.float32) + b1_ref[...]
    h = _elu_f32(h)
    h = jnp.dot(h.astype(jnp.bfloat16), w2_ref[...],
                preferred_element_type=jnp.float32) + b2_ref[...]
    h = _elu_f32(h)
    h = jnp.dot(h.astype(jnp.bfloat16), w3_ref[...],
                preferred_element_type=jnp.float32) + b3_ref[...]
    h = _elu_f32(h)
    # Head (H2 -> 1): VPU multiply with a broadcast (1, H2) row + XLU lane
    # reduction; keeps the N=1 matmul off the MXU critical path.
    v = jnp.sum(h * w4_ref[...], axis=-1, keepdims=True) + b4_ref[...]
    out_ref[...] = v.astype(out_ref.dtype)


@functools.partial(jax.jit, static_argnames=("block_b",))
def critic_evaluate(obs, params, *, block_b=512):
    """obs: (B, num_critic_obs) f32 -> value: (B, 1) f32.

    params: list of (w_i (in, out) f32, b_i (1, out) f32) for the 4 layers
    (weights stored transposed vs. torch's (out, in)).
    """
    (w1, b1), (w2, b2), (w3, b3), (w4, b4) = params
    B, D = obs.shape

    # bf16 MXU operands for the hidden layers; f32 everywhere else.
    w1b = w1.astype(jnp.bfloat16)
    w2b = w2.astype(jnp.bfloat16)
    w3b = w3.astype(jnp.bfloat16)
    # Head weight presented as a (1, H2) f32 row for the VPU path.
    w4r = w4.reshape(1, -1).astype(jnp.float32)
    b4r = b4.reshape(1, 1).astype(jnp.float32)

    # Batch tiling: TB rows per grid step (multiple of 8), pad B up to a
    # multiple of TB. Weights stay resident across the batch loop.
    tb = _round_up(min(block_b, _round_up(B, 8)), 8)
    b_pad = _round_up(B, tb)
    if b_pad != B:
        obs = jnp.pad(obs, ((0, b_pad - B), (0, 0)))
    num_tiles = b_pad // tb

    def resident(shape):
        # Full array, same block index for every grid step -> DMA'd once and
        # kept resident in VMEM.
        return pl.BlockSpec(shape, lambda i, _r=len(shape): (0,) * _r)

    out = pl.pallas_call(
        critic_kernel,
        out_shape=jax.ShapeDtypeStruct((b_pad, 1), jnp.float32),
        grid=(num_tiles,),
        in_specs=[
            pl.BlockSpec((tb, D), lambda i: (i, 0)),      # obs: pipelined
            resident(w1b.shape), resident(b1.shape),
            resident(w2b.shape), resident(b2.shape),
            resident(w3b.shape), resident(b3.shape),
            resident(w4r.shape), resident(b4r.shape),
        ],
        out_specs=pl.BlockSpec((tb, 1), lambda i: (i, 0)),
        compiler_params=pltpu.CompilerParams(
            dimension_semantics=("parallel",)),
    )(obs, w1b, b1, w2b, b2, w3b, b3, w4r, b4r)

    return out[:B]


def init_critic_params(key, num_critic_obs, critic_hidden_dims=(256, 256, 256)):
    """Deterministic synthetic init (uniform +-1/sqrt(fan_in), like torch)."""
    dims = [num_critic_obs] + list(critic_hidden_dims) + [1]
    params = []
    for i in range(len(dims) - 1):
        key, kw, kb = jax.random.split(key, 3)
        fan_in = dims[i]
        bound = 1.0 / jnp.sqrt(jnp.float32(fan_in))
        w = jax.random.uniform(kw, (dims[i], dims[i + 1]), jnp.float32, -bound, bound)
        b = jax.random.uniform(kb, (1, dims[i + 1]), jnp.float32, -bound, bound)
        params.append((w, b))
    return params


def critic_evaluate_ref(obs, params):
    """Pure-JAX reference mimicking the kernel's bf16-operand matmuls."""
    (w1, b1), (w2, b2), (w3, b3), (w4, b4) = params

    def mm_bf16(h, w, b):
        hb = h.astype(jnp.bfloat16).astype(jnp.float32)
        wb = w.astype(jnp.bfloat16).astype(jnp.float32)
        return hb @ wb + b

    h = _elu_f32(mm_bf16(obs, w1, b1))
    h = _elu_f32(mm_bf16(h, w2, b2))
    h = _elu_f32(mm_bf16(h, w3, b3))
    return h @ w4 + b4  # f32 head


if __name__ == "__main__":
    key = jax.random.PRNGKey(0)
    B = 64
    num_critic_obs = 48
    hidden = (256, 256, 256)   # module default critic_hidden_dims

    key, k_obs, k_par = jax.random.split(key, 3)
    obs = jax.random.normal(k_obs, (B, num_critic_obs), jnp.float32)
    params = init_critic_params(k_par, num_critic_obs, hidden)

    # block_b=32 -> grid of 2 batch tiles (demonstrates the pipelined,
    # megacore-shardable batch axis at this small demo size; production
    # would use 512-2048).
    value = critic_evaluate(obs, params, block_b=32)
    value = jax.block_until_ready(value)

    ref = critic_evaluate_ref(obs, params)
    assert value.shape == (B, 1)
    assert jnp.allclose(value, ref, atol=1e-4, rtol=1e-4), "mismatch vs reference"

    print("KERNEL_OK")
</pallas_src>

<mosaic_0001>
module attributes {stable_mosaic.version = 11 : i64} {
  func.func @critic_kernel(%arg0: i32, %arg1: memref<32x48xf32, #tpu.memory_space<vmem>>, %arg2: memref<48x256xbf16, #tpu.memory_space<vmem>>, %arg3: memref<1x256xf32, #tpu.memory_space<vmem>>, %arg4: memref<256x256xbf16, #tpu.memory_space<vmem>>, %arg5: memref<1x256xf32, #tpu.memory_space<vmem>>, %arg6: memref<256x256xbf16, #tpu.memory_space<vmem>>, %arg7: memref<1x256xf32, #tpu.memory_space<vmem>>, %arg8: memref<1x256xf32, #tpu.memory_space<vmem>>, %arg9: memref<1x1xf32, #tpu.memory_space<vmem>>, %arg10: memref<32x1xf32, #tpu.memory_space<vmem>>) attributes {dimension_semantics = [#tpu.dimension_semantics<parallel>], iteration_bounds = array<i64: 2>, scalar_prefetch = 0 : i64, scratch_operands = 0 : i64, tpu.core_type = #tpu.core_type<tc>, window_params = [{transform_indices = @transform_0, window_bounds = array<i64: 32, 48>}, {pipeline_mode = #tpu.pipeline_mode<synchronous>, transform_indices = @transform_1, window_bounds = array<i64: 48, 256>}, {pipeline_mode = #tpu.pipeline_mode<synchronous>, transform_indices = @transform_2, window_bounds = array<i64: 1, 256>}, {pipeline_mode = #tpu.pipeline_mode<synchronous>, transform_indices = @transform_3, window_bounds = array<i64: 256, 256>}, {pipeline_mode = #tpu.pipeline_mode<synchronous>, transform_indices = @transform_4, window_bounds = array<i64: 1, 256>}, {pipeline_mode = #tpu.pipeline_mode<synchronous>, transform_indices = @transform_5, window_bounds = array<i64: 256, 256>}, {pipeline_mode = #tpu.pipeline_mode<synchronous>, transform_indices = @transform_6, window_bounds = array<i64: 1, 256>}, {pipeline_mode = #tpu.pipeline_mode<synchronous>, transform_indices = @transform_7, window_bounds = array<i64: 1, 256>}, {pipeline_mode = #tpu.pipeline_mode<synchronous>, transform_indices = @transform_8, window_bounds = array<i64: 1, 1>}, {transform_indices = @transform_9, window_bounds = array<i64: 32, 1>}]} {
    %c0 = arith.constant 0 : index
    %c0_0 = arith.constant 0 : index
    %0 = vector.load %arg1[%c0, %c0_0] : memref<32x48xf32, #tpu.memory_space<vmem>>, vector<32x48xf32>
    %1 = arith.truncf %0 : vector<32x48xf32> to vector<32x48xbf16>
    %c0_1 = arith.constant 0 : index
    %c0_2 = arith.constant 0 : index
    %2 = vector.load %arg2[%c0_1, %c0_2] : memref<48x256xbf16, #tpu.memory_space<vmem>>, vector<48x256xbf16>
    %cst = arith.constant dense<0.000000e+00> : vector<32x256xf32>
    %3 = tpu.matmul %1, %2, %cst {dimension_numbers = #tpu.dot_dimension_numbers<[1], [0], [0], [1], [0, 0, 1, 1], [], []>} : vector<32x48xbf16>, vector<48x256xbf16>, vector<32x256xf32> -> vector<32x256xf32>
    %c0_3 = arith.constant 0 : index
    %c0_4 = arith.constant 0 : index
    %4 = vector.load %arg3[%c0_3, %c0_4] : memref<1x256xf32, #tpu.memory_space<vmem>>, vector<1x256xf32>
    %5 = vector.broadcast %4 : vector<1x256xf32> to vector<32x256xf32>
    %6 = arith.addf %3, %5 : vector<32x256xf32>
    %cst_5 = arith.constant 0.000000e+00 : f32
    %7 = vector.broadcast %cst_5 : f32 to vector<32x256xf32>
    %8 = arith.cmpf ogt, %6, %7 : vector<32x256xf32>
    %cst_6 = arith.constant 0.000000e+00 : f32
    %9 = vector.broadcast %cst_6 : f32 to vector<32x256xf32>
    %10 = arith.minimumf %6, %9 : vector<32x256xf32>
    %11 = math.exp %10 : vector<32x256xf32>
    %cst_7 = arith.constant 1.000000e+00 : f32
    %12 = vector.broadcast %cst_7 : f32 to vector<32x256xf32>
    %13 = arith.subf %11, %12 : vector<32x256xf32>
    %14 = arith.select %8, %6, %13 : vector<32x256xi1>, vector<32x256xf32>
    %15 = arith.truncf %14 : vector<32x256xf32> to vector<32x256xbf16>
    %c0_8 = arith.constant 0 : index
    %c0_9 = arith.constant 0 : index
    %16 = vector.load %arg4[%c0_8, %c0_9] : memref<256x256xbf16, #tpu.memory_space<vmem>>, vector<256x256xbf16>
    %cst_10 = arith.constant dense<0.000000e+00> : vector<32x256xf32>
    %17 = tpu.matmul %15, %16, %cst_10 {dimension_numbers = #tpu.dot_dimension_numbers<[1], [0], [0], [1], [0, 0, 1, 1], [], []>} : vector<32x256xbf16>, vector<256x256xbf16>, vector<32x256xf32> -> vector<32x256xf32>
    %c0_11 = arith.constant 0 : index
    %c0_12 = arith.constant 0 : index
    %18 = vector.load %arg5[%c0_11, %c0_12] : memref<1x256xf32, #tpu.memory_space<vmem>>, vector<1x256xf32>
    %19 = vector.broadcast %18 : vector<1x256xf32> to vector<32x256xf32>
    %20 = arith.addf %17, %19 : vector<32x256xf32>
    %cst_13 = arith.constant 0.000000e+00 : f32
    %21 = vector.broadcast %cst_13 : f32 to vector<32x256xf32>
    %22 = arith.cmpf ogt, %20, %21 : vector<32x256xf32>
    %cst_14 = arith.constant 0.000000e+00 : f32
    %23 = vector.broadcast %cst_14 : f32 to vector<32x256xf32>
    %24 = arith.minimumf %20, %23 : vector<32x256xf32>
    %25 = math.exp %24 : vector<32x256xf32>
    %cst_15 = arith.constant 1.000000e+00 : f32
    %26 = vector.broadcast %cst_15 : f32 to vector<32x256xf32>
    %27 = arith.subf %25, %26 : vector<32x256xf32>
    %28 = arith.select %22, %20, %27 : vector<32x256xi1>, vector<32x256xf32>
    %29 = arith.truncf %28 : vector<32x256xf32> to vector<32x256xbf16>
    %c0_16 = arith.constant 0 : index
    %c0_17 = arith.constant 0 : index
    %30 = vector.load %arg6[%c0_16, %c0_17] : memref<256x256xbf16, #tpu.memory_space<vmem>>, vector<256x256xbf16>
    %cst_18 = arith.constant dense<0.000000e+00> : vector<32x256xf32>
    %31 = tpu.matmul %29, %30, %cst_18 {dimension_numbers = #tpu.dot_dimension_numbers<[1], [0], [0], [1], [0, 0, 1, 1], [], []>} : vector<32x256xbf16>, vector<256x256xbf16>, vector<32x256xf32> -> vector<32x256xf32>
    %c0_19 = arith.constant 0 : index
    %c0_20 = arith.constant 0 : index
    %32 = vector.load %arg7[%c0_19, %c0_20] : memref<1x256xf32, #tpu.memory_space<vmem>>, vector<1x256xf32>
    %33 = vector.broadcast %32 : vector<1x256xf32> to vector<32x256xf32>
    %34 = arith.addf %31, %33 : vector<32x256xf32>
    %cst_21 = arith.constant 0.000000e+00 : f32
    %35 = vector.broadcast %cst_21 : f32 to vector<32x256xf32>
    %36 = arith.cmpf ogt, %34, %35 : vector<32x256xf32>
    %cst_22 = arith.constant 0.000000e+00 : f32
    %37 = vector.broadcast %cst_22 : f32 to vector<32x256xf32>
    %38 = arith.minimumf %34, %37 : vector<32x256xf32>
    %39 = math.exp %38 : vector<32x256xf32>
    %cst_23 = arith.constant 1.000000e+00 : f32
    %40 = vector.broadcast %cst_23 : f32 to vector<32x256xf32>
    %41 = arith.subf %39, %40 : vector<32x256xf32>
    %42 = arith.select %36, %34, %41 : vector<32x256xi1>, vector<32x256xf32>
    %c0_24 = arith.constant 0 : index
    %c0_25 = arith.constant 0 : index
    %43 = vector.load %arg8[%c0_24, %c0_25] : memref<1x256xf32, #tpu.memory_space<vmem>>, vector<1x256xf32>
    %44 = vector.broadcast %43 : vector<1x256xf32> to vector<32x256xf32>
    %45 = arith.mulf %42, %44 : vector<32x256xf32>
    %cst_26 = arith.constant dense<0.000000e+00> : vector<32xf32>
    %46 = vector.multi_reduction <add>, %45, %cst_26 [1] : vector<32x256xf32> to vector<32xf32>
    %47 = vector.shape_cast %46 : vector<32xf32> to vector<32x1xf32>
    %c0_27 = arith.constant 0 : index
    %c0_28 = arith.constant 0 : index
    %48 = vector.load %arg9[%c0_27, %c0_28] : memref<1x1xf32, #tpu.memory_space<vmem>>, vector<1x1xf32>
    %49 = vector.broadcast %48 : vector<1x1xf32> to vector<32x1xf32>
    %50 = arith.addf %47, %49 : vector<32x1xf32>
    %c0_29 = arith.constant 0 : index
    %c0_30 = arith.constant 0 : index
    %51 = vector.load %arg10[%c0_29, %c0_30] : memref<32x1xf32, #tpu.memory_space<vmem>>, vector<32x1xf32>
    tpu.vector_store %arg10[%c0_29, %c0_30], %50 {strides = array<i32>} : memref<32x1xf32, #tpu.memory_space<vmem>>, vector<32x1xf32>,
    return
  }
  func.func @transform_0(%arg0: i32) -> (i32, i32) {
    %c0_i32 = arith.constant 0 : i32
    %c0_i32_0 = arith.constant 0 : i32
    return %arg0, %c0_i32 : i32, i32
  }
  func.func @transform_1(%arg0: i32) -> (i32, i32) {
    %c0_i32 = arith.constant 0 : i32
    %c0_i32_0 = arith.constant 0 : i32
    %c0_i32_1 = arith.constant 0 : i32
    return %c0_i32, %c0_i32_0 : i32, i32
  }
  func.func @transform_2(%arg0: i32) -> (i32, i32) {
    %c0_i32 = arith.constant 0 : i32
    %c0_i32_0 = arith.constant 0 : i32
    %c0_i32_1 = arith.constant 0 : i32
    return %c0_i32, %c0_i32_0 : i32, i32
  }
  func.func @transform_3(%arg0: i32) -> (i32, i32) {
    %c0_i32 = arith.constant 0 : i32
    %c0_i32_0 = arith.constant 0 : i32
    %c0_i32_1 = arith.constant 0 : i32
    return %c0_i32, %c0_i32_0 : i32, i32
  }
  func.func @transform_4(%arg0: i32) -> (i32, i32) {
    %c0_i32 = arith.constant 0 : i32
    %c0_i32_0 = arith.constant 0 : i32
    %c0_i32_1 = arith.constant 0 : i32
    return %c0_i32, %c0_i32_0 : i32, i32
  }
  func.func @transform_5(%arg0: i32) -> (i32, i32) {
    %c0_i32 = arith.constant 0 : i32
    %c0_i32_0 = arith.constant 0 : i32
    %c0_i32_1 = arith.constant 0 : i32
    return %c0_i32, %c0_i32_0 : i32, i32
  }
  func.func @transform_6(%arg0: i32) -> (i32, i32) {
    %c0_i32 = arith.constant 0 : i32
    %c0_i32_0 = arith.constant 0 : i32
    %c0_i32_1 = arith.constant 0 : i32
    return %c0_i32, %c0_i32_0 : i32, i32
  }
  func.func @transform_7(%arg0: i32) -> (i32, i32) {
    %c0_i32 = arith.constant 0 : i32
    %c0_i32_0 = arith.constant 0 : i32
    %c0_i32_1 = arith.constant 0 : i32
    return %c0_i32, %c0_i32_0 : i32, i32
  }
  func.func @transform_8(%arg0: i32) -> (i32, i32) {
    %c0_i32 = arith.constant 0 : i32
    %c0_i32_0 = arith.constant 0 : i32
    %c0_i32_1 = arith.constant 0 : i32
    return %c0_i32, %c0_i32_0 : i32, i32
  }
  func.func @transform_9(%arg0: i32) -> (i32, i32) {
    %c0_i32 = arith.constant 0 : i32
    %c0_i32_0 = arith.constant 0 : i32
    return %arg0, %c0_i32 : i32, i32
  }
}

</mosaic_0001>

<bundles_post_ra>
// kernel: critic_evaluate.1
= control target key start
LH: loop header
LB: loop body
LE: loop exit
PB: predicated region body
PF: predicated region fallthrough
CT: control target
= control target key end

     0   :  { %s1555_s11 = smov 0   ;;  %s1815_s0 = inlined_call_operand.vmem [shape: f32[64,48], index: 0, kind: input, shape index: {}]   ;;  %s1816_s1 = inlined_call_operand.vmem [shape: bf16[48,256], index: 1, kind: input, shape index: {}]   ;;  %s1817_s2 = inlined_call_operand.vmem [shape: f32[1,256], index: 2, kind: input, shape index: {}]   ;;  %s1818_s3 = inlined_call_operand.vmem [shape: bf16[256,256], index: 3, kind: input, shape index: {}]   ;;  %s1819_s4 = inlined_call_operand.vmem [shape: f32[1,256], index: 4, kind: input, shape index: {}]   ;;  %s1820_s5 = inlined_call_operand.vmem [shape: bf16[256,256], index: 5, kind: input, shape index: {}]   ;;  %s1821_s6 = inlined_call_operand.vmem [shape: f32[1,256], index: 6, kind: input, shape index: {}]   ;;  %s1822_s7 = inlined_call_operand.vmem [shape: f32[1,256], index: 7, kind: input, shape index: {}]   ;;  %s1823_s8 = inlined_call_operand.<no memory space> [shape: f32[1,1], index: 8, kind: input, shape index: {}]   ;;  %s1824_s9 = inlined_call_operand.vmem [shape: f32[64,1], index: 9, kind: output, shape index: {}]  }
   0x1   :  { %v14_v0 = vstv %s1823_s8 }
   0x2   :  { %15 = vst [vmem:[#allocation2] sm:$0x1] %v14_v0 }
   0x3 LB: > { %s1223_s12 = sadd.s32 4294967295, %s1499_s11   ;;  %p1227_p0 = scmp.ge.s32.totalorder %s1499_s11, 1  ;;  %s1499_s11 = sphi %s1555_s11, %s21_s11  }
   0x4   : > { %p290_p1 = scmp.lt.s32.totalorder %s1499_s11, 3 }
   0x6   : > { %p291_p2 = pnand %p1227_p0, %p290_p1 }
   0x7   : > { %v1340_v1 = vld [vmem:[%s1816_s1 + $0x4] ss:$8 sps:$4 sm:$0xff] (!%p291_p2)   ;;  %s1228_s8 = sshll.u32 (!%p291_p2), %s1223_s12, 2  ;;  %v1342_v2 = vld [vmem:[%s1816_s1] ss:$8 sps:$4 sm:$0xff] (!%p291_p2)   ;;  %v1501_v3 = vmov (!%p291_p2), 0  }
   0x8   : > { %294 = sbr.rel (%p291_p2) target bundleno = 891 (0x37b), region = 56  ;;  %432 = vmatprep.mubr.bf16.mxu0 (!%p291_p2), %v1501_v3  ;;  %p327_p3 = scmp.lt.s32.totalorder (!%p291_p2), %s1228_s8, 7  ;;  %400 = vmatprep.subr.bf16.mxu0 (!%p291_p2), %v1340_v1  ;;  %v1343_v4 = vld [vmem:[%s1816_s1 + $0x14] ss:$8 sps:$4 sm:$0xff] (!%p291_p2)   ;;  %v1345_v5 = vld [vmem:[%s1816_s1 + $0x10] ss:$8 sps:$4 sm:$0xff] (!%p291_p2)  }
   0x9   : > { %401 = vmatpush1.bf16.msra.mxu0 (!%p291_p2), %v1342_v2  ;;  %v1346_v6 = vld [vmem:[%s1816_s1 + $0x24] ss:$8 sps:$4 sm:$0xff] (!%p291_p2)   ;;  %v1351_v8 = vld [vmem:[%s1818_s3] ss:$8 sps:$4 sm:$0xff] (!%p291_p2)   ;;  %v1352_v10 = vld [vmem:[%s1818_s3 + $0x14] ss:$8 sps:$4 sm:$0xff] (!%p291_p2)   ;;  %v353_v2 = vlaneseq (!%p291_p2) }
   0xa   : > { %402 = vmatprep.subr.bf16.mxu0 (!%p291_p2), %v1343_v4  ;;  %v1349_v7 = vld [vmem:[%s1818_s3 + $0x4] ss:$8 sps:$4 sm:$0xff] (!%p291_p2)   ;;  %v1348_v9 = vld [vmem:[%s1816_s1 + $0x20] ss:$8 sps:$4 sm:$0xff] (!%p291_p2)   ;;  %v1354_v13 = vld [vmem:[%s1818_s3 + $0x10] ss:$8 sps:$4 sm:$0xff] (!%p291_p2)  }
   0xb   : > { %709 = vmatprep.subr.bf16.mxu1 (!%p291_p2), %v1349_v7  ;;  %v1355_v14 = vld [vmem:[%s1818_s3 + $0x24] ss:$8 sps:$4 sm:$0xff] (!%p291_p2)   ;;  %vm393_vm0 = vcmask (!%p291_p2), 392192   ;;  %v1357_v16 = vld [vmem:[%s1818_s3 + $0x20] ss:$8 sps:$4 sm:$0xff] (!%p291_p2)  }
   0xc   : > { %710 = vmatpush1.bf16.msra.mxu1 (!%p291_p2), %v1351_v8  ;;  %v1358_v17 = vld [vmem:[%s1818_s3 + $0x34] ss:$8 sps:$4 sm:$0xff] (!%p291_p2)   ;;  %v1360_v20 = vld [vmem:[%s1818_s3 + $0x30] ss:$8 sps:$4 sm:$0xff] (!%p291_p2)   ;;  %v1361_v21 = vld [vmem:[%s1818_s3 + $0x44] ss:$8 sps:$4 sm:$0xff] (!%p291_p2)  }
   0xd   : > { %403 = vmatpush1.bf16.msra.mxu0 (!%p291_p2), %v1345_v5  ;;  %711 = vmatprep.subr.bf16.mxu1 (!%p291_p2), %v1352_v10  ;;  %v1363_v23 = vld [vmem:[%s1818_s3 + $0x40] ss:$8 sps:$4 sm:$0xff] (!%p291_p2)   ;;  %v1364_v24 = vld [vmem:[%s1818_s3 + $0x54] ss:$8 sps:$4 sm:$0xff] (!%p291_p2)   ;;  %v1366_v25 = vld [vmem:[%s1818_s3 + $0x50] ss:$8 sps:$4 sm:$0xff] (!%p291_p2)  }
   0xe   : > { %404 = vmatprep.subr.bf16.mxu0 (!%p291_p2), %v1346_v6  ;;  %v1367_v26 = vld [vmem:[%s1818_s3 + $0x64] ss:$8 sps:$4 sm:$0xff] (!%p291_p2)   ;;  %v1369_v27 = vld [vmem:[%s1818_s3 + $0x60] ss:$8 sps:$4 sm:$0xff] (!%p291_p2)   ;;  %v1370_v28 = vld [vmem:[%s1818_s3 + $0x74] ss:$8 sps:$4 sm:$0xff] (!%p291_p2)  }
   0xf   : > { %s1826_s8 = smov (!%p327_p3, %s1228_s8), 7  ;;  %v1372_v29 = vld [vmem:[%s1818_s3 + $0x70] ss:$8 sps:$4 sm:$0xff]   ;;  %v1373_v30 = vld [vmem:[%s1818_s3 + $0x84] ss:$8 sps:$4 sm:$0xff]  }
  0x10   : > { %s1229_s25 = sshll.u32 %s1826_s8, 3  ;;  %712 = vmatpush1.bf16.msra.mxu1 %v1354_v13  ;;  %v1375_v31 = vld [vmem:[%s1818_s3 + $0x80] ss:$8 sps:$4 sm:$0xff]   ;;  %v1376_v32 = vld [vmem:[%s1818_s3 + $0x94] ss:$8 sps:$4 sm:$0xff]  }
  0x11   : > { %s330_s12 = scalar_lea.vmem %s1815_s0, %s1229_s25  ;;  %405 = vmatpush1.bf16.msra.mxu0 %v1348_v9  ;;  %713 = vmatprep.subr.bf16.mxu1 %v1355_v14  ;;  %v1378_v33 = vld [vmem:[%s1818_s3 + $0x90] ss:$8 sps:$4 sm:$0xff]   ;;  %v1379_v34 = vld [vmem:[%s1818_s3 + $0xa4] ss:$8 sps:$4 sm:$0xff]   ;;  %v1381_v35 = vld [vmem:[%s1818_s3 + $0xa0] ss:$8 sps:$4 sm:$0xff]   ;;  %s336_s14 = scalar_lea.vmem %s1824_s9, %s1229_s25 }
  0x12   : > { %v339_v11 = vld [vmem:[%s330_s12] sm:$0xff]  ;;  %v340_v12 = vld [vmem:[%s330_s12 + $0x8] sm:$0xff]  ;;  %v341_v18 = vld [vmem:[%s330_s12 + $0x10] sm:$0xff] }
  0x13   : > { %v343_v15 = vpack.c.bf16 %v340_v12, %v339_v11  ;;  %v342_v19 = vld [vmem:[%s330_s12 + $0x18] sm:$0xff]  ;;  %v1385_v38 = vld [vmem:[%s1818_s3 + $0xc4] ss:$8 sps:$4 sm:$0xff]   ;;  %v1387_v39 = vld [vmem:[%s1818_s3 + $0xc0] ss:$8 sps:$4 sm:$0xff]  }
  0x14   : > { %714 = vmatpush1.bf16.msra.mxu1 %v1357_v16  ;;  %v344_v22 = vpack.c.bf16 %v342_v19, %v341_v18  ;;  %v1382_v36 = vld [vmem:[%s1818_s3 + $0xb4] ss:$8 sps:$4 sm:$0xff]   ;;  %v1384_v37 = vld [vmem:[%s1818_s3 + $0xb0] ss:$8 sps:$4 sm:$0xff]   ;;  %v1391_v42 = vld [vmem:[%s1818_s3 + $0xe4] ss:$8 sps:$4 sm:$0xff]  }
  0x15   : > { %1238 = vmatmul.mubr.msk.bf16.vlgmr.msra.gmra.mrb[0].mxu0 %vm393_vm0, %v343_v15  ;;  %715 = vmatprep.subr.bf16.mxu1 %v1358_v17  ;;  %v1388_v40 = vld [vmem:[%s1818_s3 + $0xd4] ss:$8 sps:$4 sm:$0xff]   ;;  %v1390_v41 = vld [vmem:[%s1818_s3 + $0xd0] ss:$8 sps:$4 sm:$0xff]   ;;  %v1393_v43 = vld [vmem:[%s1818_s3 + $0xe0] ss:$8 sps:$4 sm:$0xff]  }
  0x16   : > { %442 = vmatprep.mubr.bf16.mxu0 %v1501_v3  ;;  %v1394_v44 = vld [vmem:[%s1818_s3 + $0xf4] ss:$8 sps:$4 sm:$0xff]   ;;  %v1396_v45 = vld [vmem:[%s1818_s3 + $0xf0] ss:$8 sps:$4 sm:$0xff]   ;;  %v1397_v46 = vld [vmem:[%s1820_s5] ss:$8 sps:$4 sm:$0xff]  }
  0x17   : > { %v1399_v47 = vld [vmem:[%s1820_s5 + $0x4] ss:$8 sps:$4 sm:$0xff]   ;;  %v1402_v48 = vld [vmem:[%s1820_s5 + $0x14] ss:$8 sps:$4 sm:$0xff]   ;;  %v1400_v49 = vld [vmem:[%s1820_s5 + $0x10] ss:$8 sps:$4 sm:$0xff]  }
  0x18   : > { %716 = vmatpush1.bf16.msra.mxu1 %v1360_v20  ;;  %1018 = vmatprep.subr.bf16.mxu0 %v1399_v47  ;;  %v1405_v50 = vld [vmem:[%s1820_s5 + $0x24] ss:$8 sps:$4 sm:$0xff]   ;;  %v1403_v51 = vld [vmem:[%s1820_s5 + $0x20] ss:$8 sps:$4 sm:$0xff]   ;;  %v1408_v52 = vld [vmem:[%s1820_s5 + $0x34] ss:$8 sps:$4 sm:$0xff]  }
  0x19   : > { %717 = vmatprep.subr.bf16.mxu1 %v1361_v21  ;;  %1019 = vmatpush1.bf16.msra.mxu0 %v1397_v46  ;;  %v1406_v53 = vld [vmem:[%s1820_s5 + $0x30] ss:$8 sps:$4 sm:$0xff]   ;;  %v1411_v54 = vld [vmem:[%s1820_s5 + $0x44] ss:$8 sps:$4 sm:$0xff]   ;;  %v1409_v55 = vld [vmem:[%s1820_s5 + $0x40] ss:$8 sps:$4 sm:$0xff]  }
  0x1a   : > { %1020 = vmatprep.subr.bf16.mxu0 %v1402_v48  ;;  %v1414_v56 = vld [vmem:[%s1820_s5 + $0x54] ss:$8 sps:$4 sm:$0xff]   ;;  %v1412_v57 = vld [vmem:[%s1820_s5 + $0x50] ss:$8 sps:$4 sm:$0xff]   ;;  %v1417_v58 = vld [vmem:[%s1820_s5 + $0x64] ss:$8 sps:$4 sm:$0xff]  }
  0x1b   : > { %v1415_v59 = vld [vmem:[%s1820_s5 + $0x60] ss:$8 sps:$4 sm:$0xff]   ;;  %v1420_v60 = vld [vmem:[%s1820_s5 + $0x74] ss:$8 sps:$4 sm:$0xff]   ;;  %v1418_v61 = vld [vmem:[%s1820_s5 + $0x70] ss:$8 sps:$4 sm:$0xff]  }
  0x1c   : > { %718 = vmatpush1.bf16.msra.mxu1 %v1363_v23  ;;  %v1423_v62 = vld [vmem:[%s1820_s5 + $0x84] ss:$8 sps:$4 sm:$0xff]   ;;  %v1421_v63 = vld [vmem:[%s1820_s5 + $0x80] ss:$8 sps:$4 sm:$0xff]   ;;  %v1426_v0 = vld [vmem:[%s1820_s5 + $0x94] ss:$8 sps:$4 sm:$0xff]  }
  0x1d   : > { %1239 = vmatmul.mubr.msk.bf16.gmra.mrb[4].mxu0 %vm393_vm0, %v344_v22  ;;  %719 = vmatprep.subr.bf16.mxu1 %v1364_v24  ;;  %v1424_v1 = vld [vmem:[%s1820_s5 + $0x90] ss:$8 sps:$4 sm:$0xff]   ;;  %v354_v3 = vshrl.u32 %v353_v2, 7  ;;  %v351_v5 = vld [vmem:[%s1817_s2] sm:$0x3] }
  0x1e   : > { %1021 = vmatpush1.bf16.msra.mxu0 %v1400_v49 }
  0x1f   : > { %1022 = vmatprep.subr.bf16.mxu0 %v1405_v50  ;;  %v1747_v4 = vsub.s32 0, %v354_v3  ;;  %v1752_v6 = vsub.s32 1, %v354_v3 }
  0x20   : > { %720 = vmatpush1.bf16.msra.mxu1 %v1366_v25 }
  0x21   : > { %721 = vmatprep.subr.bf16.mxu1 %v1367_v26  ;;  %v356_v7 = vrot.slane %v351_v5, %v1747_v4  ;;  %v360_v8 = vrot.slane %v351_v5, %v1752_v6 }
  0x22   : > { %1023 = vmatpush1.bf16.msra.mxu0 %v1403_v51 }
  0x23   : > { %1024 = vmatprep.subr.bf16.mxu0 %v1408_v52 }
  0x24   : > { %722 = vmatpush1.bf16.msra.mxu1 %v1369_v27 }
  0x25   : > { %723 = vmatprep.subr.bf16.mxu1 %v1370_v28 }
  0x26   : > { %1025 = vmatpush1.bf16.msra.mxu0 %v1406_v53 }
  0x27   : > { %1026 = vmatprep.subr.bf16.mxu0 %v1411_v54 }
  0x28   : > { %724 = vmatpush1.bf16.msra.mxu1 %v1372_v29 }
  0x29   : > { %725 = vmatprep.subr.bf16.mxu1 %v1373_v30 }
  0x2a   : > { %1027 = vmatpush1.bf16.msra.mxu0 %v1409_v55 }
  0x2b   : > { %1028 = vmatprep.subr.bf16.mxu0 %v1414_v56 }
  0x2c   : > { %726 = vmatpush1.bf16.msra.mxu1 %v1375_v31 }
  0x2d   : > { %727 = vmatprep.subr.bf16.mxu1 %v1376_v32 }
  0x2e   : > { %1029 = vmatpush1.bf16.msra.mxu0 %v1412_v57 }
  0x2f   : > { %1030 = vmatprep.subr.bf16.mxu0 %v1417_v58 }
  0x30   : > { %728 = vmatpush1.bf16.msra.mxu1 %v1378_v33 }
  0x31   : > { %729 = vmatprep.subr.bf16.mxu1 %v1379_v34 }
  0x32   : > { %1031 = vmatpush1.bf16.msra.mxu0 %v1415_v59 }
  0x33   : > { %1032 = vmatprep.subr.bf16.mxu0 %v1420_v60 }
  0x34   : > { %730 = vmatpush1.bf16.msra.mxu1 %v1381_v35 }
  0x35   : > { %731 = vmatprep.subr.bf16.mxu1 %v1382_v36 }
  0x36   : > { %1033 = vmatpush1.bf16.msra.mxu0 %v1418_v61 }
  0x37   : > { %1034 = vmatprep.subr.bf16.mxu0 %v1423_v62 }
  0x38   : > { %732 = vmatpush1.bf16.msra.mxu1 %v1384_v37 }
  0x39   : > { %733 = vmatprep.subr.bf16.mxu1 %v1385_v38 }
  0x3a   : > { %1035 = vmatpush1.bf16.msra.mxu0 %v1421_v63 }
  0x3b   : > { %1036 = vmatprep.subr.bf16.mxu0 %v1426_v0 }
  0x3c   : > { %734 = vmatpush1.bf16.msra.mxu1 %v1387_v39 }
  0x3d   : > { %735 = vmatprep.subr.bf16.mxu1 %v1388_v40 }
  0x3e   : > { %1037 = vmatpush1.bf16.msra.mxu0 %v1424_v1 }
  0x40   : > { %736 = vmatpush1.bf16.msra.mxu1 %v1390_v41 }
  0x41   : > { %737 = vmatprep.subr.bf16.mxu1 %v1391_v42 }
  0x44   : > { %738 = vmatpush1.bf16.msra.mxu1 %v1393_v43 }
  0x45   : > { %739 = vmatprep.subr.bf16.mxu1 %v1394_v44 }
  0x48   : > { %740 = vmatpush1.bf16.msra.mxu1 %v1396_v45 }
  0xe8   : > { %v434_v9 = vpop.f32.mrb[0].mxu0 }
  0xe9   : > { %v435_v10 = vadd.f32 %v434_v9, %v356_v7  ;;  %v436_v11 = vpop.f32.mrb[1].mxu0  ;;  %v1432_v9 = vld [vmem:[%s1820_s5 + $0xb4] ss:$8 sps:$4 sm:$0xff]  }
  0xea   : > { %v437_v12 = vadd.f32 %v436_v11, %v360_v8  ;;  %v438_v13 = vpop.f32.mrb[2].mxu0  ;;  %v1435_v11 = vld [vmem:[%s1820_s5 + $0xc4] ss:$8 sps:$4 sm:$0xff]  }
  0xeb   : > { %v461_v14 = vmin.f32 %v435_v10, 0.0  ;;  %v439_v15 = vadd.f32 %v438_v13, %v356_v7  ;;  %v440_v16 = vpop.f32.mrb[3].mxu0  ;;  %vm453_vm1 = vcmp.gt.f32.partialorder %v435_v10, 0.0  ;;  %v1438_v13 = vld [vmem:[%s1820_s5 + $0xd4] ss:$8 sps:$4 sm:$0xff]  }
  0xec   : > { %v462_v17 = vmin.f32 %v437_v12, 0.0  ;;  %v441_v18 = vadd.f32 %v440_v16, %v360_v8  ;;  %vm454_vm3 = vcmp.gt.f32.partialorder %v437_v12, 0.0  ;;  %v1439_v16 = vld [vmem:[%s1820_s5 + $0xe0] ss:$8 sps:$4 sm:$0xff]  }
  0xed   : > { %v469_v19 = vmul.f32 1.442695, %v461_v14  ;;  %v463_v20 = vmin.f32 %v439_v15, 0.0  ;;  %vm455_vm2 = vcmp.gt.f32.partialorder %v439_v15, 0.0  ;;  %v1436_v14 = vld [vmem:[%s1820_s5 + $0xd0] ss:$8 sps:$4 sm:$0xff]  }
  0xee   : > { %v471_v21 = vmul.f32 1.442695, %v462_v17  ;;  %v464_v22 = vmin.f32 %v441_v18, 0.0  ;;  %vm456_vm4 = vcmp.gt.f32.partialorder %v441_v18, 0.0  ;;  %v1444_v17 = vld [vmem:[%s1820_s5 + $0xf4] ss:$8 sps:$4 sm:$0xff]  }
  0xef   : > { %1445 = vpow2.f32 %v469_v19  ;;  %v473_v23 = vmul.f32 1.442695, %v463_v20  ;;  %v537_v19 = vld [vmem:[%s1819_s4] sm:$0x3] }
  0xf0   : > { %1447 = vpow2.f32 %v471_v21  ;;  %v475_v24 = vmul.f32 1.442695, %v464_v22  ;;  %v444_v25 = vpop.f32.mrb[4].mxu0  ;;  %v542_v20 = vrot.slane %v537_v19, %v1747_v4  ;;  %v546_v21 = vrot.slane %v537_v19, %v1752_v6 }
  0xf1   : > { %1449 = vpow2.f32 %v473_v23  ;;  %v445_v26 = vadd.f32 %v444_v25, %v356_v7  ;;  %v446_v27 = vpop.f32.mrb[5].mxu0 }
  0xf2   : > { %1451 = vpow2.f32 %v475_v24  ;;  %v447_v28 = vadd.f32 %v446_v27, %v360_v8  ;;  %v448_v29 = vpop.f32.mrb[6].mxu0 }
  0xf3   : > { %v465_v30 = vmin.f32 %v445_v26, 0.0  ;;  %v449_v31 = vadd.f32 %v448_v29, %v356_v7  ;;  %v450_v32 = vpop.f32.mrb[7].mxu0  ;;  %vm457_vm5 = vcmp.gt.f32.partialorder %v445_v26, 0.0  ;;  %v1429_v7 = vld [vmem:[%s1820_s5 + $0xa4] ss:$8 sps:$4 sm:$0xff]  }
  0xf4   : > { %v466_v33 = vmin.f32 %v447_v28, 0.0  ;;  %v451_v34 = vadd.f32 %v450_v32, %v360_v8  ;;  %vm458_vm7 = vcmp.gt.f32.partialorder %v447_v28, 0.0  ;;  %v1427_v8 = vld [vmem:[%s1820_s5 + $0xa0] ss:$8 sps:$4 sm:$0xff]   ;;  %1038 = vmatprep.subr.bf16.mxu0 %v1429_v7 }
  0xf5   : > { %v477_v35 = vmul.f32 1.442695, %v465_v30  ;;  %v467_v36 = vmin.f32 %v449_v31, 0.0  ;;  %vm459_vm6 = vcmp.gt.f32.partialorder %v449_v31, 0.0  ;;  %1039 = vmatpush1.bf16.msra.mxu0 %v1427_v8 }
  0xf6   : > { %v479_v37 = vmul.f32 1.442695, %v466_v33  ;;  %v468_v38 = vmin.f32 %v451_v34, 0.0  ;;  %vm460_vm8 = vcmp.gt.f32.partialorder %v451_v34, 0.0  ;;  %1040 = vmatprep.subr.bf16.mxu0 %v1432_v9 }
  0xf7   : > { %1453 = vpow2.f32 %v477_v35  ;;  %v481_v39 = vmul.f32 1.442695, %v467_v36 }
  0xf8   : > { %1455 = vpow2.f32 %v479_v37  ;;  %v483_v40 = vmul.f32 1.442695, %v468_v38 }
  0xf9   : > { %v1446_v41 = vpop.eup %1445  ;;  %1457 = vpow2.f32 %v481_v39 }
  0xfa   : > { %v1448_v42 = vpop.eup %1447  ;;  %v1240_v43 = vadd.f32 -1.0, %v1446_v41  ;;  %1459 = vpow2.f32 %v483_v40 }
  0xfb   : > { %v1450_v44 = vpop.eup %1449  ;;  %v1241_v45 = vadd.f32 -1.0, %v1448_v42 }
  0xfc   : > { %v1452_v46 = vpop.eup %1451  ;;  %v1242_v47 = vadd.f32 -1.0, %v1450_v44  ;;  %v493_v49 = vsel %vm453_vm1, %v435_v10, %v1240_v43  ;;  %v1430_v10 = vld [vmem:[%s1820_s5 + $0xb0] ss:$8 sps:$4 sm:$0xff]  }
  0xfd   : > { %v1243_v48 = vadd.f32 -1.0, %v1452_v46  ;;  %v494_v51 = vsel %vm454_vm3, %v437_v12, %v1241_v45  ;;  %1041 = vmatpush1.bf16.msra.mxu0 %v1430_v10  ;;  %v1433_v12 = vld [vmem:[%s1820_s5 + $0xc0] ss:$8 sps:$4 sm:$0xff]  }
  0xfe   : > { %v495_v50 = vsel %vm455_vm2, %v439_v15, %v1242_v47  ;;  %1042 = vmatprep.subr.bf16.mxu0 %v1435_v11  ;;  %v1441_v15 = vld [vmem:[%s1820_s5 + $0xe4] ss:$8 sps:$4 sm:$0xff]  }
  0xff   : > { %v496_v52 = vsel %vm456_vm4, %v441_v18, %v1243_v48  ;;  %v501_v53 = vpack.c.bf16 %v495_v50, %v493_v49  ;;  %v1442_v18 = vld [vmem:[%s1820_s5 + $0xf0] ss:$8 sps:$4 sm:$0xff]  }
 0x100   : > { %v502_v54 = vpack.c.bf16 %v496_v52, %v494_v51 }
 0x101   : > { %v1454_v55 = vpop.eup %1453  ;;  %1043 = vmatpush1.bf16.msra.mxu0 %v1433_v12 }
 0x102   : > { %v1456_v56 = vpop.eup %1455  ;;  %v1244_v57 = vadd.f32 -1.0, %v1454_v55  ;;  %741 = vmatprep.mubr.bf16.mxu1 %v502_v54  ;;  %1044 = vmatprep.subr.bf16.mxu0 %v1438_v13 }
 0x103   : > { %v1458_v58 = vpop.eup %1457  ;;  %v1245_v59 = vadd.f32 -1.0, %v1456_v56  ;;  %742 = vmatmul.mubr.bf16.vlgmr.msra.gmra.mrb[0].mxu1 %v501_v53 }
 0x104   : > { %v1460_v60 = vpop.eup %1459  ;;  %v1246_v61 = vadd.f32 -1.0, %v1458_v58  ;;  %v497_v63 = vsel %vm457_vm5, %v445_v26, %v1244_v57 }
 0x105   : > { %v1247_v62 = vadd.f32 -1.0, %v1460_v60  ;;  %v498_v1 = vsel %vm458_vm7, %v447_v28, %v1245_v59  ;;  %1045 = vmatpush1.bf16.msra.mxu0 %v1436_v14 }
 0x106   : > { %v499_v0 = vsel %vm459_vm6, %v449_v31, %v1246_v61  ;;  %1046 = vmatprep.subr.bf16.mxu0 %v1441_v15 }
 0x107   : > { %v500_v2 = vsel %vm460_vm8, %v451_v34, %v1247_v62  ;;  %v503_v3 = vpack.c.bf16 %v499_v0, %v497_v63 }
 0x108   : > { %v504_v5 = vpack.c.bf16 %v500_v2, %v498_v1 }
 0x109   : > { %1047 = vmatpush1.bf16.msra.mxu0 %v1439_v16 }
 0x10a   : > { %751 = vmatprep.mubr.bf16.mxu1 %v504_v5  ;;  %1048 = vmatprep.subr.bf16.mxu0 %v1444_v17 }
 0x10b   : > { %752 = vmatmul.mubr.bf16.gmra.mrb[4].mxu1 %v503_v3 }
 0x10d   : > { %1049 = vmatpush1.bf16.msra.mxu0 %v1442_v18 }
 0x1d6   : > { %v743_v22 = vpop.f32.mrb[0].mxu1 }
 0x1d7   : > { %v744_v23 = vadd.f32 %v743_v22, %v542_v20  ;;  %v745_v24 = vpop.f32.mrb[1].mxu1 }
 0x1d8   : > { %v746_v25 = vadd.f32 %v745_v24, %v546_v21  ;;  %v747_v26 = vpop.f32.mrb[2].mxu1 }
 0x1d9   : > { %v770_v27 = vmin.f32 %v744_v23, 0.0  ;;  %v748_v28 = vadd.f32 %v747_v26, %v542_v20  ;;  %v749_v29 = vpop.f32.mrb[3].mxu1  ;;  %vm762_vm9 = vcmp.gt.f32.partialorder %v744_v23, 0.0 }
 0x1da   : > { %v771_v30 = vmin.f32 %v746_v25, 0.0  ;;  %v750_v31 = vadd.f32 %v749_v29, %v546_v21  ;;  %vm763_vm11 = vcmp.gt.f32.partialorder %v746_v25, 0.0 }
 0x1db   : > { %v778_v32 = vmul.f32 1.442695, %v770_v27  ;;  %v772_v33 = vmin.f32 %v748_v28, 0.0  ;;  %vm764_vm10 = vcmp.gt.f32.partialorder %v748_v28, 0.0 }
 0x1dc   : > { %v780_v34 = vmul.f32 1.442695, %v771_v30  ;;  %v773_v35 = vmin.f32 %v750_v31, 0.0  ;;  %vm765_vm12 = vcmp.gt.f32.partialorder %v750_v31, 0.0 }
 0x1dd   : > { %1461 = vpow2.f32 %v778_v32  ;;  %v782_v36 = vmul.f32 1.442695, %v772_v33 }
 0x1de   : > { %1463 = vpow2.f32 %v780_v34  ;;  %v784_v37 = vmul.f32 1.442695, %v773_v35  ;;  %v753_v38 = vpop.f32.mrb[4].mxu1 }
 0x1df   : > { %1465 = vpow2.f32 %v782_v36  ;;  %v754_v39 = vadd.f32 %v753_v38, %v542_v20  ;;  %v755_v40 = vpop.f32.mrb[5].mxu1 }
 0x1e0   : > { %1467 = vpow2.f32 %v784_v37  ;;  %v756_v41 = vadd.f32 %v755_v40, %v546_v21  ;;  %v757_v42 = vpop.f32.mrb[6].mxu1 }
 0x1e1   : > { %v774_v43 = vmin.f32 %v754_v39, 0.0  ;;  %v758_v44 = vadd.f32 %v757_v42, %v542_v20  ;;  %v759_v45 = vpop.f32.mrb[7].mxu1  ;;  %vm766_vm13 = vcmp.gt.f32.partialorder %v754_v39, 0.0  ;;  %v846_v20 = vld [vmem:[%s1821_s6] sm:$0x3] }
 0x1e2   : > { %v775_v46 = vmin.f32 %v756_v41, 0.0  ;;  %v760_v47 = vadd.f32 %v759_v45, %v546_v21  ;;  %vm767_vm15 = vcmp.gt.f32.partialorder %v756_v41, 0.0  ;;  %v851_v21 = vrot.slane %v846_v20, %v1747_v4 }
 0x1e3   : > { %v786_v48 = vmul.f32 1.442695, %v774_v43  ;;  %v776_v49 = vmin.f32 %v758_v44, 0.0  ;;  %vm768_vm14 = vcmp.gt.f32.partialorder %v758_v44, 0.0  ;;  %v855_v22 = vrot.slane %v846_v20, %v1752_v6 }
 0x1e4   : > { %v788_v50 = vmul.f32 1.442695, %v775_v46  ;;  %v777_v51 = vmin.f32 %v760_v47, 0.0  ;;  %vm769_vm0 = vcmp.gt.f32.partialorder %v760_v47, 0.0 }
 0x1e5   : > { %1469 = vpow2.f32 %v786_v48  ;;  %v790_v52 = vmul.f32 1.442695, %v776_v49 }
 0x1e6   : > { %1471 = vpow2.f32 %v788_v50  ;;  %v792_v53 = vmul.f32 1.442695, %v777_v51 }
 0x1e7   : > { %v1462_v54 = vpop.eup %1461  ;;  %1473 = vpow2.f32 %v790_v52 }
 0x1e8   : > { %v1464_v55 = vpop.eup %1463  ;;  %v1280_v56 = vadd.f32 -1.0, %v1462_v54  ;;  %1475 = vpow2.f32 %v792_v53  ;;  %v1119_v53 = vld [vmem:[%s1822_s7] sm:$0x3] }
 0x1e9   : > { %v1466_v57 = vpop.eup %1465  ;;  %v1281_v58 = vadd.f32 -1.0, %v1464_v55 }
 0x1ea   : > { %v1468_v59 = vpop.eup %1467  ;;  %v1282_v60 = vadd.f32 -1.0, %v1466_v57  ;;  %v802_v62 = vsel %vm762_vm9, %v744_v23, %v1280_v56  ;;  %v1124_v57 = vrot.slane %v1119_v53, %v1747_v4  ;;  %vm1162_vm9 = vcmask 7168  }
 0x1eb   : > { %v1283_v61 = vadd.f32 -1.0, %v1468_v59  ;;  %v803_v1 = vsel %vm763_vm11, %v746_v25, %v1281_v58 }
 0x1ec   : > { %v804_v63 = vsel %vm764_vm10, %v748_v28, %v1282_v60  ;;  %v1128_v60 = vrot.slane %v1119_v53, %v1752_v6 }
 0x1ed   : > { %v810_v0 = vpack.c.bf16 %v804_v63, %v802_v62  ;;  %v805_v2 = vsel %vm765_vm12, %v750_v31, %v1283_v61 }
 0x1ee   : > { %v811_v3 = vpack.c.bf16 %v805_v2, %v803_v1 }
 0x1ef   : > { %v1470_v5 = vpop.eup %1469 }
 0x1f0   : > { %v1472_v7 = vpop.eup %1471  ;;  %v1284_v8 = vadd.f32 -1.0, %v1470_v5  ;;  %1050 = vmatprep.mubr.bf16.mxu0 %v811_v3 }
 0x1f1   : > { %v1474_v9 = vpop.eup %1473  ;;  %v1285_v10 = vadd.f32 -1.0, %v1472_v7  ;;  %1051 = vmatmul.mubr.bf16.vlgmr.msra.gmra.mrb[8].mxu0 %v810_v0 }
 0x1f2   : > { %v1476_v11 = vpop.eup %1475  ;;  %v1286_v12 = vadd.f32 -1.0, %v1474_v9  ;;  %v806_v14 = vsel %vm766_vm13, %v754_v39, %v1284_v8 }
 0x1f3   : > { %v1287_v13 = vadd.f32 -1.0, %v1476_v11  ;;  %v807_v16 = vsel %vm767_vm15, %v756_v41, %v1285_v10 }
 0x1f4   : > { %v808_v15 = vsel %vm768_vm14, %v758_v44, %v1286_v12 }
 0x1f5   : > { %v809_v17 = vsel %vm769_vm0, %v760_v47, %v1287_v13  ;;  %v812_v18 = vpack.c.bf16 %v808_v15, %v806_v14 }
 0x1f6   : > { %v813_v19 = vpack.c.bf16 %v809_v17, %v807_v16 }
 0x1f8   : > { %1060 = vmatprep.mubr.bf16.mxu0 %v813_v19 }
 0x1f9   : > { %1061 = vmatmul.mubr.bf16.gmra.mrb[12].mxu0 %v812_v18 }
 0x2c4   : > { %v1052_v23 = vpop.f32.mrb[8].mxu0 }
 0x2c5   : > { %v1053_v24 = vadd.f32 %v1052_v23, %v851_v21  ;;  %v1054_v25 = vpop.f32.mrb[9].mxu0 }
 0x2c6   : > { %v1055_v26 = vadd.f32 %v1054_v25, %v855_v22  ;;  %v1056_v27 = vpop.f32.mrb[10].mxu0 }
 0x2c7   : > { %v1079_v28 = vmin.f32 %v1053_v24, 0.0  ;;  %v1057_v29 = vadd.f32 %v1056_v27, %v851_v21  ;;  %v1058_v30 = vpop.f32.mrb[11].mxu0  ;;  %vm1071_vm1 = vcmp.gt.f32.partialorder %v1053_v24, 0.0 }
 0x2c8   : > { %v1080_v31 = vmin.f32 %v1055_v26, 0.0  ;;  %v1059_v32 = vadd.f32 %v1058_v30, %v855_v22  ;;  %vm1072_vm2 = vcmp.gt.f32.partialorder %v1055_v26, 0.0  ;;  %v1328_v30 = vld [vmem:[#allocation2] ss:$0 sm:$0xff] }
 0x2c9   : > { %v1087_v33 = vmul.f32 1.442695, %v1079_v28  ;;  %v1081_v34 = vmin.f32 %v1057_v29, 0.0  ;;  %vm1073_vm3 = vcmp.gt.f32.partialorder %v1057_v29, 0.0 }
 0x2ca   : > { %v1089_v35 = vmul.f32 1.442695, %v1080_v31  ;;  %v1082_v36 = vmin.f32 %v1059_v32, 0.0  ;;  %vm1074_vm4 = vcmp.gt.f32.partialorder %v1059_v32, 0.0 }
 0x2cb   : > { %1477 = vpow2.f32 %v1087_v33  ;;  %v1091_v37 = vmul.f32 1.442695, %v1081_v34 }
 0x2cc   : > { %1479 = vpow2.f32 %v1089_v35  ;;  %v1093_v38 = vmul.f32 1.442695, %v1082_v36  ;;  %v1062_v39 = vpop.f32.mrb[12].mxu0 }
 0x2cd   : > { %1481 = vpow2.f32 %v1091_v37  ;;  %v1063_v40 = vadd.f32 %v1062_v39, %v851_v21  ;;  %v1064_v41 = vpop.f32.mrb[13].mxu0 }
 0x2ce   : > { %1483 = vpow2.f32 %v1093_v38  ;;  %v1065_v42 = vadd.f32 %v1064_v41, %v855_v22  ;;  %v1066_v43 = vpop.f32.mrb[14].mxu0 }
 0x2cf   : > { %v1083_v44 = vmin.f32 %v1063_v40, 0.0  ;;  %v1067_v45 = vadd.f32 %v1066_v43, %v851_v21  ;;  %v1068_v46 = vpop.f32.mrb[15].mxu0  ;;  %vm1075_vm5 = vcmp.gt.f32.partialorder %v1063_v40, 0.0 }
 0x2d0   : > { %v1084_v47 = vmin.f32 %v1065_v42, 0.0  ;;  %v1069_v48 = vadd.f32 %v1068_v46, %v855_v22  ;;  %vm1076_vm6 = vcmp.gt.f32.partialorder %v1065_v42, 0.0 }
 0x2d1   : > { %v1095_v49 = vmul.f32 1.442695, %v1083_v44  ;;  %v1085_v50 = vmin.f32 %v1067_v45, 0.0  ;;  %vm1077_vm7 = vcmp.gt.f32.partialorder %v1067_v45, 0.0 }
 0x2d2   : > { %v1097_v51 = vmul.f32 1.442695, %v1084_v47  ;;  %v1086_v52 = vmin.f32 %v1069_v48, 0.0  ;;  %vm1078_vm8 = vcmp.gt.f32.partialorder %v1069_v48, 0.0 }
 0x2d3   : > { %1485 = vpow2.f32 %v1095_v49  ;;  %v1099_v54 = vmul.f32 1.442695, %v1085_v50 }
 0x2d4   : > { %1487 = vpow2.f32 %v1097_v51  ;;  %v1101_v55 = vmul.f32 1.442695, %v1086_v52 }
 0x2d5   : > { %v1478_v56 = vpop.eup %1477  ;;  %1489 = vpow2.f32 %v1099_v54 }
 0x2d6   : > { %v1480_v58 = vpop.eup %1479  ;;  %1491 = vpow2.f32 %v1101_v55  ;;  %v1320_v59 = vadd.f32 -1.0, %v1478_v56 }
 0x2d7   : > { %v1482_v61 = vpop.eup %1481  ;;  %v1321_v62 = vadd.f32 -1.0, %v1480_v58 }
 0x2d8   : > { %v1484_v63 = vpop.eup %1483  ;;  %v1322_v0 = vadd.f32 -1.0, %v1482_v61  ;;  %v1111_v1 = vsel %vm1071_vm1, %v1053_v24, %v1320_v59 }
 0x2d9   : > { %v1323_v2 = vadd.f32 -1.0, %v1484_v63  ;;  %v1112_v3 = vsel %vm1072_vm2, %v1055_v26, %v1321_v62  ;;  %v1131_v5 = vmul.f32 %v1124_v57, %v1111_v1 }
 0x2da   : > { %v1132_v7 = vmul.f32 %v1128_v60, %v1112_v3  ;;  %v1113_v8 = vsel %vm1073_vm3, %v1057_v29, %v1322_v0 }
 0x2db   : > { %v1114_v4 = vsel %vm1074_vm4, %v1059_v32, %v1323_v2  ;;  %v1133_v9 = vmul.f32 %v1124_v57, %v1113_v8 }
 0x2dc   : > { %v1139_v10 = vadd.f32 %v1132_v7, %v1131_v5  ;;  %v1134_v11 = vmul.f32 %v1128_v60, %v1114_v4 }
 0x2dd   : > { %v1486_v12 = vpop.eup %1485 }
 0x2de   : > { %v1488_v6 = vpop.eup %1487  ;;  %1140 = vadd.xlane.f32.xlu0 %v1139_v10  ;;  %v1142_v13 = vadd.f32 %v1134_v11, %v1133_v9  ;;  %v1324_v14 = vadd.f32 -1.0, %v1486_v12 }
 0x2df   : > { %v1490_v15 = vpop.eup %1489  ;;  %v1325_v16 = vadd.f32 -1.0, %v1488_v6 }
 0x2e0   : > { %v1492_v17 = vpop.eup %1491  ;;  %v1326_v18 = vadd.f32 -1.0, %v1490_v15  ;;  %v1115_v19 = vsel %vm1075_vm5, %v1063_v40, %v1324_v14 }
 0x2e1   : > { %v1327_v20 = vadd.f32 -1.0, %v1492_v17  ;;  %v1116_v21 = vsel %vm1076_vm6, %v1065_v42, %v1325_v16  ;;  %v1135_v22 = vmul.f32 %v1124_v57, %v1115_v19 }
 0x2e2   : > { %1143 = vadd.xlane.f32.xlu0 %v1142_v13  ;;  %v1136_v23 = vmul.f32 %v1128_v60, %v1116_v21  ;;  %v1117_v24 = vsel %vm1077_vm7, %v1067_v45, %v1326_v18 }
 0x2e3   : > { %v1118_v25 = vsel %vm1078_vm8, %v1069_v48, %v1327_v20  ;;  %v1137_v26 = vmul.f32 %v1124_v57, %v1117_v24 }
 0x2e4   : > { %v1145_v27 = vadd.f32 %v1136_v23, %v1135_v22  ;;  %v1138_v28 = vmul.f32 %v1128_v60, %v1118_v25 }
 0x2e6   : > { %1146 = vadd.xlane.f32.xlu1 %v1145_v27  ;;  %v1148_v29 = vadd.f32 %v1138_v28, %v1137_v26 }
 0x2ea   : > { %1149 = vadd.xlane.f32.xlu1 %v1148_v29 }
 0x36b   : > { %v1141_v31 = vpop.xlane.xlu0 %1140 }
 0x36c   : > { %v1158_v32 = vadd.f32 %v1328_v30, %v1141_v31 }
 0x36e   : > { %1163 = vst.msk [vmem:[%s336_s14] sm:$0xff] %vm1162_vm9, %v1158_v32 }
 0x36f   : > { %v1144_v33 = vpop.xlane.xlu0 %1143 }
 0x370   : > { %v1159_v34 = vadd.f32 %v1328_v30, %v1144_v33 }
 0x372   : > { %1164 = vst.msk [vmem:[%s336_s14 + $0x8] sm:$0xff] %vm1162_vm9, %v1159_v34 }
 0x373   : > { %v1147_v35 = vpop.xlane.xlu1 %1146 }
 0x374   : > { %v1160_v36 = vadd.f32 %v1328_v30, %v1147_v35 }
 0x376   : > { %1165 = vst.msk [vmem:[%s336_s14 + $0x10] sm:$0xff] %vm1162_vm9, %v1160_v36 }
 0x377   : > { %v1150_v37 = vpop.xlane.xlu1 %1149 }
 0x378   : > { %v1161_v38 = vadd.f32 %v1328_v30, %v1150_v37 }
 0x37a   : > { %1166 = vst.msk [vmem:[%s336_s14 + $0x18] sm:$0xff] %vm1162_vm9, %v1161_v38 }
 0x37b PF: > { %s21_s11 = sadd.s32 1, %s1499_s11  }
 0x37c   : > { %p18_p4 = scmp.ge.s32.totalorder %s21_s11, 4  }
 0x37e   :  { %20 = sbr.rel (!%p18_p4) target bundleno = 3 (0x3), region = 86 }

</bundles_post_ra>
